<compile_context>
chip_gen: v7x
topology: tpu7x:2x2x1
jax: 0.10.0
libtpu: 0.0.40
codegen_flags: <defaults>
</compile_context>

<pallas_src>
import functools
import math

import jax
import jax.numpy as jnp
from jax.experimental import pallas as pl
from jax.experimental.pallas import tpu as pltpu


def _ceil_to(x: int, m: int) -> int:
    return -(-x // m) * m


def _cdiv(a: int, b: int) -> int:
    return -(-a // b)


def _tpu_config():
    """(per-input block byte target, vmem_limit cap, tensorcores per chip)."""
    try:
        kind = jax.devices()[0].device_kind.lower()
    except Exception:
        kind = ""
    if "v7" in kind:
        # ~3.2 TB/s HBM, 64 MiB VMEM per TC, 2 TCs: bigger blocks keep the
        # ~0.35 us grid-step overhead <5%, but cap VMEM well under 64 MiB.
        return 4 << 20, 48 << 20, 2
    if ("v4" in kind) or ("v5p" in kind) or kind.strip().endswith("v5"):
        # Megacore generations: 2 TCs, plenty of physical VMEM (128 MiB).
        return 2 << 20, 96 << 20, 2
    if ("v6" in kind) or ("v5" in kind):
        # v6e / v5e: single TC, 128 MiB physical VMEM.
        return 2 << 20, 96 << 20, 1
    return 2 << 20, 32 << 20, 1


def _choose_tiles(rows: int, T: int, itemsizes, target_bytes: int, cores: int):
    """Pick (row_block, t_block, n_time_splits); row block FIRST, then time."""
    itemsize = max(itemsizes)
    sub = max(32 // s for s in itemsizes)  # sublane multiple (8 f32 / 16 bf16)

    # ---- row block -------------------------------------------------------
    if rows <= 1024:
        row_block = rows                   # full extent: always legal, no pad rows
        n_rb = 1
    else:
        row_block = 1024
        n_rb = _cdiv(rows, row_block)
        # Keep row blocks balanced across the two TensorCores (v7x / megacore).
        if cores >= 2 and n_rb % cores != 0:
            n_rb = _ceil_to(n_rb, cores)
            row_block = _ceil_to(_cdiv(rows, n_rb), sub)
            n_rb = _cdiv(rows, row_block)

    # ---- time block: fill up to ~target_bytes per (sublane-padded) block --
    padded_rb = _ceil_to(row_block, sub)   # VMEM pads sublanes to 8/16
    t_target = max(128, target_bytes // (padded_rb * itemsize))
    if t_target >= T:
        t_block = T                        # full extent: always legal
    else:
        t_block = max(128, (t_target // 128) * 128)
    n_tb = _cdiv(T, t_block)

    # ---- time split: feed the second TensorCore when rows are few ---------
    n_splits = 1
    if cores >= 2 and n_rb == 1 and n_tb >= 2:
        n_splits = cores
    return row_block, t_block, n_splits


def _sdr_partial_kernel(pred_ref, gt_ref, num_out_ref, den_out_ref,
                        num_acc, den_acc, *,
                        q, n_t_blocks, t_block, total_t, mask_tail, need_guard):
    s = pl.program_id(0)                   # time-split index
    t = pl.program_id(2)                   # time-block index within this split
    gblk = s * q + t                       # global time-block index

    @pl.when(t == 0)
    def _():
        num_acc[...] = jnp.zeros_like(num_acc)
        den_acc[...] = jnp.zeros_like(den_acc)

    def accum_fast():
        # Keep few full-block f32 temporaries live at once: finish the gt^2
        # reduction before forming the error block.
        gt = gt_ref[...].astype(jnp.float32)
        num_acc[...] += jnp.sum(gt * gt, axis=-1, keepdims=True)
        err = pred_ref[...].astype(jnp.float32) - gt
        den_acc[...] += jnp.sum(err * err, axis=-1, keepdims=True)

    def accum_tail():
        # Partial last time tile only: mask out-of-range lanes with a
        # (1, t_block) iota broadcast (not a full-block iota).
        col = jax.lax.broadcasted_iota(jnp.int32, (1, t_block), 1)
        valid = (gblk * t_block + col) < total_t
        gt = jnp.where(valid, gt_ref[...].astype(jnp.float32), 0.0)
        num_acc[...] += jnp.sum(gt * gt, axis=-1, keepdims=True)
        err = jnp.where(valid, pred_ref[...].astype(jnp.float32) - gt, 0.0)
        den_acc[...] += jnp.sum(err * err, axis=-1, keepdims=True)

    if mask_tail:
        is_tail = gblk == (n_t_blocks - 1)
        if need_guard:
            pl.when(gblk < (n_t_blocks - 1))(accum_fast)
        else:
            pl.when(jnp.logical_not(is_tail))(accum_fast)
        pl.when(is_tail)(accum_tail)
    else:
        if need_guard:
            pl.when(gblk < n_t_blocks)(accum_fast)
        else:
            accum_fast()

    @pl.when(t == q - 1)
    def _():
        num_out_ref[...] = num_acc[...]
        den_out_ref[...] = den_acc[...]


def sdr_loss(pred, gt, upper_bound=None, negative=True, *,
             t_block=None, num_time_splits=None):
    """Pallas equivalent of Sdr(upper_bound, negative)(pred, gt).

    pred, gt: (..., T) float arrays (f32 or bf16). Returns float32 with the
    trailing time axis reduced away.  `t_block` / `num_time_splits` are
    test-only overrides; leave None for auto selection.
    """
    assert pred.shape == gt.shape
    *lead, T = pred.shape
    rows = int(math.prod(lead)) if lead else 1

    # Collapsing leading dims is a cheap reshape (no data-dependent copy).
    pred2 = pred.reshape(rows, T)
    gt2 = gt.reshape(rows, T)

    itemsizes = (jnp.dtype(pred.dtype).itemsize, jnp.dtype(gt.dtype).itemsize)
    sub = max(32 // s for s in itemsizes)
    target_bytes, vmem_cap, cores = _tpu_config()

    row_block, auto_t, auto_splits = _choose_tiles(rows, T, itemsizes,
                                                   target_bytes, cores)
    if t_block is None:
        t_block = auto_t
    n_splits = auto_splits if num_time_splits is None else int(num_time_splits)

    n_rb = _cdiv(rows, row_block)
    n_tb = _cdiv(T, t_block)
    q = _cdiv(n_tb, n_splits)              # time blocks handled per split
    rows_out = n_rb * row_block
    mask_tail = (T % t_block) != 0
    need_guard = (n_splits * q) != n_tb    # some splits see past-the-end blocks

    kernel = functools.partial(
        _sdr_partial_kernel,
        q=q, n_t_blocks=n_tb, t_block=t_block,
        total_t=T, mask_tail=mask_tail, need_guard=need_guard)

    if need_guard:
        # Clamp overflow iterations onto the last valid block (the kernel's
        # scalar guard skips their accumulation); keeps the DMA in bounds.
        def t_index(s, t):
            return jnp.minimum(s * q + t, n_tb - 1)
    else:
        def t_index(s, t):
            return s * q + t

    def make_in_spec():
        return pl.BlockSpec((row_block, t_block),
                            lambda s, i, t: (i, t_index(s, t)))

    out_spec = pl.BlockSpec((None, row_block, 1), lambda s, i, t: (s, i, 0))

    # VMEM budget: double-buffered inputs + ~3 live full-block f32 temporaries
    # (upcasts / err / squares) + slack.  Never clamp below the 32 MiB
    # platform default; cap per generation (v7x only has 64 MiB per TC).
    padded_rb = _ceil_to(row_block, sub)
    blk_elems = padded_rb * t_block
    in_bytes = blk_elems * (itemsizes[0] + itemsizes[1])
    vmem_limit = int(min(max(2 * in_bytes + 3 * blk_elems * 4 + (4 << 20),
                             32 << 20),
                         vmem_cap))

    num_parts, den_parts = pl.pallas_call(
        kernel,
        out_shape=(jax.ShapeDtypeStruct((n_splits, rows_out, 1), jnp.float32),
                   jax.ShapeDtypeStruct((n_splits, rows_out, 1), jnp.float32)),
        grid=(n_splits, n_rb, q),
        in_specs=[make_in_spec(), make_in_spec()],
        out_specs=(out_spec, out_spec),
        scratch_shapes=[
            pltpu.VMEM((row_block, 1), jnp.float32),  # signal energy acc
            pltpu.VMEM((row_block, 1), jnp.float32),  # error energy acc
        ],
        compiler_params=pltpu.CompilerParams(
            dimension_semantics=("parallel", "parallel", "arbitrary"),
            vmem_limit_bytes=vmem_limit,
        ),
    )(pred2, gt2)

    # Combine partial energies (slice garbage padded rows away first) and run
    # the tiny epilogue on `rows` elements in plain JAX.
    num = jnp.sum(num_parts[:, :rows, 0], axis=0)
    den = jnp.sum(den_parts[:, :rows, 0], axis=0)
    eps = jnp.float32(1e-8)
    sdr = 10.0 * jnp.log10((num + eps) / (den + eps))
    if negative:
        sdr = -sdr
    if upper_bound is not None:
        sdr = jnp.minimum(sdr, jnp.float32(upper_bound))
    return sdr.reshape(tuple(lead))


def _sdr_reference(pred, gt, upper_bound=None, negative=True):
    pred = pred.astype(jnp.float32)
    gt = gt.astype(jnp.float32)
    eps = jnp.float32(1e-8)
    num = jnp.sum(gt * gt, axis=-1)
    den = jnp.sum((pred - gt) ** 2, axis=-1)
    sdr = 10.0 * jnp.log10((num + eps) / (den + eps))
    if negative:
        sdr = -sdr
    if upper_bound is not None:
        sdr = jnp.minimum(sdr, upper_bound)
    return sdr


if __name__ == "__main__":
    key = jax.random.PRNGKey(0)
    k1, k2, k3, k4 = jax.random.split(key, 4)

    # Config 1: small f32 case, single tile, negate + clip (auto tiles).
    B, C, T = 2, 4, 512
    gt = jax.random.normal(k1, (B, C, T), dtype=jnp.float32)
    pred = gt + 0.1 * jax.random.normal(k2, (B, C, T), dtype=jnp.float32)
    out = jax.block_until_ready(sdr_loss(pred, gt, upper_bound=30.0, negative=True))
    ref = _sdr_reference(pred, gt, upper_bound=30.0, negative=True)
    assert out.shape == (B, C)
    assert jnp.allclose(out, ref, rtol=1e-3, atol=1e-3), (out, ref)

    # Config 2: forces T-blocked accumulation, masked partial tail tile,
    # a 2-way time split with an uneven block count (guard + clamped index
    # map), and the wrapper-side partial-sum combine.
    B2, C2, T2 = 2, 4, 1000
    gt2 = jax.random.normal(k3, (B2, C2, T2), dtype=jnp.float32)
    pred2 = gt2 + 0.3 * jax.random.normal(k4, (B2, C2, T2), dtype=jnp.float32)
    out2 = jax.block_until_ready(
        sdr_loss(pred2, gt2, upper_bound=None, negative=False,
                 t_block=384, num_time_splits=2))
    ref2 = _sdr_reference(pred2, gt2, upper_bound=None, negative=False)
    assert out2.shape == (B2, C2)
    assert jnp.allclose(out2, ref2, rtol=1e-3, atol=1e-3), (out2, ref2)

    # Config 3: bf16 inputs stay bf16 in HBM (halved DMA), 16-row sublane tile.
    B3, C3, T3 = 4, 8, 512
    gt3 = jax.random.normal(k1, (B3, C3, T3), dtype=jnp.float32).astype(jnp.bfloat16)
    pred3 = (
        gt3.astype(jnp.float32)
        + 0.2 * jax.random.normal(k2, (B3, C3, T3), dtype=jnp.float32)
    ).astype(jnp.bfloat16)
    out3 = jax.block_until_ready(sdr_loss(pred3, gt3, upper_bound=20.0, negative=True))
    ref3 = _sdr_reference(pred3, gt3, upper_bound=20.0, negative=True)
    assert jnp.allclose(out3, ref3, rtol=1e-3, atol=1e-3), (out3, ref3)

    print("KERNEL_OK")
</pallas_src>

<mosaic_0001>
module attributes {stable_mosaic.version = 11 : i64} {
  func.func @_sdr_partial_kernel(%arg0: i32, %arg1: i32, %arg2: i32, %arg3: memref<8x512xf32, #tpu.memory_space<vmem>>, %arg4: memref<8x512xf32, #tpu.memory_space<vmem>>, %arg5: memref<1x8x1xf32, #tpu.memory_space<vmem>>, %arg6: memref<1x8x1xf32, #tpu.memory_space<vmem>>, %arg7: memref<8x1xf32, #tpu.memory_space<vmem>>, %arg8: memref<8x1xf32, #tpu.memory_space<vmem>>) attributes {dimension_semantics = [#tpu.dimension_semantics<parallel>, #tpu.dimension_semantics<parallel>, #tpu.dimension_semantics<arbitrary>], iteration_bounds = array<i64: 1, 1, 1>, scalar_prefetch = 0 : i64, scratch_operands = 2 : i64, tpu.core_type = #tpu.core_type<tc>, window_params = [{transform_indices = @transform_0, window_bounds = array<i64: 8, 512>}, {transform_indices = @transform_1, window_bounds = array<i64: 8, 512>}, {transform_indices = @transform_2, window_bounds = array<i64: 1, 8, 1>}, {transform_indices = @transform_3, window_bounds = array<i64: 1, 8, 1>}]} {
    %c0_i32 = arith.constant 0 : i32
    %0 = arith.cmpi eq, %arg2, %c0_i32 : i32
    %1 = arith.extui %0 : i1 to i32
    %c0_i32_0 = arith.constant 0 : i32
    %2 = arith.cmpi ne, %1, %c0_i32_0 : i32
    scf.if %2 {
      %cst_15 = arith.constant 0.000000e+00 : f32
      %21 = vector.broadcast %cst_15 : f32 to vector<8x1xf32>
      %c0_16 = arith.constant 0 : index
      %c0_17 = arith.constant 0 : index
      %22 = vector.load %arg7[%c0_16, %c0_17] : memref<8x1xf32, #tpu.memory_space<vmem>>, vector<8x1xf32>
      tpu.vector_store %arg7[%c0_16, %c0_17], %21 {strides = array<i32>} : memref<8x1xf32, #tpu.memory_space<vmem>>, vector<8x1xf32>,
      %cst_18 = arith.constant 0.000000e+00 : f32
      %23 = vector.broadcast %cst_18 : f32 to vector<8x1xf32>
      %c0_19 = arith.constant 0 : index
      %c0_20 = arith.constant 0 : index
      %24 = vector.load %arg8[%c0_19, %c0_20] : memref<8x1xf32, #tpu.memory_space<vmem>>, vector<8x1xf32>
      tpu.vector_store %arg8[%c0_19, %c0_20], %23 {strides = array<i32>} : memref<8x1xf32, #tpu.memory_space<vmem>>, vector<8x1xf32>,
    } else {
    }
    %c0 = arith.constant 0 : index
    %c0_1 = arith.constant 0 : index
    %3 = vector.load %arg4[%c0, %c0_1] : memref<8x512xf32, #tpu.memory_space<vmem>>, vector<8x512xf32>
    %c0_2 = arith.constant 0 : index
    %c0_3 = arith.constant 0 : index
    %4 = vector.load %arg7[%c0_2, %c0_3] : memref<8x1xf32, #tpu.memory_space<vmem>>, vector<8x1xf32>
    %5 = arith.mulf %3, %3 : vector<8x512xf32>
    %cst = arith.constant dense<0.000000e+00> : vector<8xf32>
    %6 = vector.multi_reduction <add>, %5, %cst [1] : vector<8x512xf32> to vector<8xf32>
    %7 = vector.shape_cast %6 : vector<8xf32> to vector<8x1xf32>
    %8 = arith.addf %4, %7 : vector<8x1xf32>
    %c0_4 = arith.constant 0 : index
    %c0_5 = arith.constant 0 : index
    %9 = vector.load %arg7[%c0_4, %c0_5] : memref<8x1xf32, #tpu.memory_space<vmem>>, vector<8x1xf32>
    tpu.vector_store %arg7[%c0_4, %c0_5], %8 {strides = array<i32>} : memref<8x1xf32, #tpu.memory_space<vmem>>, vector<8x1xf32>,
    %c0_6 = arith.constant 0 : index
    %c0_7 = arith.constant 0 : index
    %10 = vector.load %arg3[%c0_6, %c0_7] : memref<8x512xf32, #tpu.memory_space<vmem>>, vector<8x512xf32>
    %11 = arith.subf %10, %3 : vector<8x512xf32>
    %c0_8 = arith.constant 0 : index
    %c0_9 = arith.constant 0 : index
    %12 = vector.load %arg8[%c0_8, %c0_9] : memref<8x1xf32, #tpu.memory_space<vmem>>, vector<8x1xf32>
    %13 = arith.mulf %11, %11 : vector<8x512xf32>
    %cst_10 = arith.constant dense<0.000000e+00> : vector<8xf32>
    %14 = vector.multi_reduction <add>, %13, %cst_10 [1] : vector<8x512xf32> to vector<8xf32>
    %15 = vector.shape_cast %14 : vector<8xf32> to vector<8x1xf32>
    %16 = arith.addf %12, %15 : vector<8x1xf32>
    %c0_11 = arith.constant 0 : index
    %c0_12 = arith.constant 0 : index
    %17 = vector.load %arg8[%c0_11, %c0_12] : memref<8x1xf32, #tpu.memory_space<vmem>>, vector<8x1xf32>
    tpu.vector_store %arg8[%c0_11, %c0_12], %16 {strides = array<i32>} : memref<8x1xf32, #tpu.memory_space<vmem>>, vector<8x1xf32>,
    %c0_i32_13 = arith.constant 0 : i32
    %18 = arith.cmpi eq, %arg2, %c0_i32_13 : i32
    %19 = arith.extui %18 : i1 to i32
    %c0_i32_14 = arith.constant 0 : i32
    %20 = arith.cmpi ne, %19, %c0_i32_14 : i32
    scf.if %20 {
      %c0_15 = arith.constant 0 : index
      %c0_16 = arith.constant 0 : index
      %21 = vector.load %arg7[%c0_15, %c0_16] : memref<8x1xf32, #tpu.memory_space<vmem>>, vector<8x1xf32>
      %c0_17 = arith.constant 0 : index
      %c0_18 = arith.constant 0 : index
      %c0_19 = arith.constant 0 : index
      %22 = vector.load %arg5[%c0_17, %c0_18, %c0_19] : memref<1x8x1xf32, #tpu.memory_space<vmem>>, vector<1x8x1xf32>
      %23 = vector.shape_cast %22 : vector<1x8x1xf32> to vector<8x1xf32>
      %24 = vector.shape_cast %21 : vector<8x1xf32> to vector<1x8x1xf32>
      tpu.vector_store %arg5[%c0_17, %c0_18, %c0_19], %24 {strides = array<i32>} : memref<1x8x1xf32, #tpu.memory_space<vmem>>, vector<1x8x1xf32>,
      %c0_20 = arith.constant 0 : index
      %c0_21 = arith.constant 0 : index
      %25 = vector.load %arg8[%c0_20, %c0_21] : memref<8x1xf32, #tpu.memory_space<vmem>>, vector<8x1xf32>
      %c0_22 = arith.constant 0 : index
      %c0_23 = arith.constant 0 : index
      %c0_24 = arith.constant 0 : index
      %26 = vector.load %arg6[%c0_22, %c0_23, %c0_24] : memref<1x8x1xf32, #tpu.memory_space<vmem>>, vector<1x8x1xf32>
      %27 = vector.shape_cast %26 : vector<1x8x1xf32> to vector<8x1xf32>
      %28 = vector.shape_cast %25 : vector<8x1xf32> to vector<1x8x1xf32>
      tpu.vector_store %arg6[%c0_22, %c0_23, %c0_24], %28 {strides = array<i32>} : memref<1x8x1xf32, #tpu.memory_space<vmem>>, vector<1x8x1xf32>,
    } else {
    }
    return
  }
  func.func @transform_0(%arg0: i32, %arg1: i32, %arg2: i32) -> (i32, i32) {
    %c1_i32 = arith.constant 1 : i32
    %0 = arith.muli %arg0, %c1_i32 : i32
    %1 = arith.addi %0, %arg2 : i32
    %c0_i32 = arith.constant 0 : i32
    return %arg1, %1 : i32, i32
  }
  func.func @transform_1(%arg0: i32, %arg1: i32, %arg2: i32) -> (i32, i32) {
    %c1_i32 = arith.constant 1 : i32
    %0 = arith.muli %arg0, %c1_i32 : i32
    %1 = arith.addi %0, %arg2 : i32
    %c0_i32 = arith.constant 0 : i32
    return %arg1, %1 : i32, i32
  }
  func.func @transform_2(%arg0: i32, %arg1: i32, %arg2: i32) -> (i32, i32, i32) {
    %c0_i32 = arith.constant 0 : i32
    %c0_i32_0 = arith.constant 0 : i32
    return %arg0, %arg1, %c0_i32 : i32, i32, i32
  }
  func.func @transform_3(%arg0: i32, %arg1: i32, %arg2: i32) -> (i32, i32, i32) {
    %c0_i32 = arith.constant 0 : i32
    %c0_i32_0 = arith.constant 0 : i32
    return %arg0, %arg1, %c0_i32 : i32, i32, i32
  }
}

</mosaic_0001>

<bundles_post_ra>
// kernel: tpu_custom_call.1
= control target key start
LH: loop header
LB: loop body
LE: loop exit
PB: predicated region body
PF: predicated region fallthrough
CT: control target
= control target key end

     0   :  { %9 = vsyncpa [#allocation5], 0  ;;  %s220_s0 = inlined_call_operand.hbm [shape: f32[8,512], index: 0, kind: input, shape index: {}]   ;;  %s221_s1 = inlined_call_operand.hbm [shape: f32[8,512], index: 1, kind: input, shape index: {}]   ;;  %s222_s2 = inlined_call_operand.vmem [shape: f32[1,8,1], index: 2, kind: output, shape index: {0}]   ;;  %s223_s3 = inlined_call_operand.vmem [shape: f32[1,8,1], index: 3, kind: output, shape index: {1}]  }
   0x1   :  { %10 = vsyncpa [#allocation7], 0  ;;  %s161_s12 = smov [#allocation4]   ;;  %s162_s14 = smov [#allocation6]  }
   0x2   :  { %s21_s13 = sshll.u32 %s161_s12, 4  ;;  %s35_s15 = sshll.u32 %s162_s14, 4  ;;  %s22_s13 = int_to_ptr.vmem [resolvable:$true] %s21_s13  ;;  %s36_s15 = int_to_ptr.vmem [resolvable:$true] %s35_s15 }
   0x3   :  { %s113_s18 = scalar_lea.hbm %s220_s0, 512 }
   0x4   :  { %p114_p0 = scmp.ne.s32.totalorder %s220_s0, %s113_s18  ;;  %p117_p1 = scmp.lt.u32.totalorder %s113_s18, %s220_s0 }
   0x6   :  { %p119_p2 = pnand %p117_p1, %p114_p0 }
   0x8   :  { %122 = shalt.err (!%p119_p2)
}
   0x9   :  { %s123_s23 = scalar_lea.vmem %s22_s13, 512  ;;  %p128_p4 = scmp.lt.s32.totalorder %s22_s13, %s22_s13 }
   0xa   :  { %p124_p3 = scmp.ne.s32.totalorder %s22_s13, %s123_s23  ;;  %p129_p5 = scmp.lt.s32.totalorder %s123_s23, %s123_s23 }
   0xc   :  { %p130_p6 = por %p129_p5, %p128_p4 }
   0xe   :  { %p131_p7 = pnand %p130_p6, %p124_p3 }
  0x10   :  { %134 = shalt.err (!%p131_p7)
}
  0x11   :  { %24 = dma.hbm_to_vmem [thread:$0]  %s220_s0, 512, %s22_s13, [#allocation5]  }
  0x12   :  { %s135_s28 = scalar_lea.hbm %s221_s1, 512 }
  0x13   :  { %p136_p8 = scmp.ne.s32.totalorder %s221_s1, %s135_s28  ;;  %p139_p9 = scmp.lt.u32.totalorder %s135_s28, %s221_s1 }
  0x15   :  { %p141_p10 = pnand %p139_p9, %p136_p8 }
  0x17   :  { %144 = shalt.err (!%p141_p10)
}
  0x18   :  { %s145_s6 = scalar_lea.vmem %s36_s15, 512  ;;  %p150_p12 = scmp.lt.s32.totalorder %s36_s15, %s36_s15 }
  0x19   :  { %p146_p11 = scmp.ne.s32.totalorder %s36_s15, %s145_s6  ;;  %p151_p13 = scmp.lt.s32.totalorder %s145_s6, %s145_s6 }
  0x1b   :  { %p152_p0 = por %p151_p13, %p150_p12 }
  0x1d   :  { %p153_p1 = pnand %p152_p0, %p146_p11 }
  0x1f   :  { %156 = shalt.err (!%p153_p1)
}
  0x20   :  { %38 = dma.hbm_to_vmem [thread:$0]  %s221_s1, 512, %s36_s15, [#allocation7]  }
  0x21   :  { %157 = dma.done.wait [#allocation5], 512  }
  0x22   :  { %158 = vsyncadd [#allocation5], 4294966784 }
  0x23   :  { %159 = dma.done.wait [#allocation7], 512  }
  0x24   :  { %160 = vsyncadd [#allocation7], 4294966784  ;;  %vm53_vm0 = vcmask 7168   ;;  %v163_v0 = vmov 0.0   ;;  %v56_v1 = vld [vmem:[#allocation6] sm:$0xff]  ;;  %v57_v2 = vld [vmem:[#allocation6 + $0x8] sm:$0xff] }
  0x25   :  { %54 = vst.msk [vmem:[#allocation2] sm:$0xff] %vm53_vm0, %v163_v0  ;;  %55 = vst.msk [vmem:[#allocation3] sm:$0xff] %vm53_vm0, %v163_v0  ;;  %v58_v3 = vld [vmem:[#allocation6 + $0x10] sm:$0xff]  ;;  %v59_v4 = vld [vmem:[#allocation6 + $0x18] sm:$0xff]  ;;  %v61_v5 = vmul.f32 %v56_v1, %v56_v1  ;;  %v62_v6 = vmul.f32 %v57_v2, %v57_v2 }
  0x26   :  { %v63_v7 = vmul.f32 %v58_v3, %v58_v3  ;;  %v73_v8 = vld [vmem:[#allocation4] sm:$0xff]  ;;  %v74_v9 = vld [vmem:[#allocation4 + $0x8] sm:$0xff]  ;;  %v75_v10 = vld [vmem:[#allocation4 + $0x10] sm:$0xff]  ;;  %v64_v14 = vmul.f32 %v59_v4, %v59_v4 }
  0x27   :  { %v76_v11 = vld [vmem:[#allocation4 + $0x18] sm:$0xff]  ;;  %v77_v12 = vsub.f32 %v73_v8, %v56_v1  ;;  %v78_v13 = vsub.f32 %v74_v9, %v57_v2  ;;  %v65_v15 = vadd.f32 %v62_v6, %v61_v5  ;;  %v79_v16 = vsub.f32 %v75_v10, %v58_v3 }
  0x28   :  { %v80_v17 = vsub.f32 %v76_v11, %v59_v4 }
  0x29   :  { %v82_v18 = vmul.f32 %v77_v12, %v77_v12  ;;  %v83_v19 = vmul.f32 %v78_v13, %v78_v13  ;;  %v66_v20 = vadd.f32 %v65_v15, %v63_v7  ;;  %v84_v21 = vmul.f32 %v79_v16, %v79_v16 }
  0x2a   :  { %v85_v22 = vmul.f32 %v80_v17, %v80_v17 }
  0x2b   :  { %v86_v23 = vadd.f32 %v83_v19, %v82_v18  ;;  %v67_v24 = vadd.f32 %v66_v20, %v64_v14 }
  0x2c   :  { %v60_v27 = vld [vmem:[#allocation2] sm:$0xff]  ;;  %v81_v30 = vld [vmem:[#allocation3] sm:$0xff] }
  0x2d   :  { %v87_v25 = vadd.f32 %v86_v23, %v84_v21  ;;  %68 = vadd.xlane.f32.xlu0 %v67_v24 }
  0x2f   :  { %v88_v26 = vadd.f32 %v87_v25, %v85_v22 }
  0x31   :  { %89 = vadd.xlane.f32.xlu0 %v88_v26 }
  0xba   :  { %v69_v28 = vpop.xlane.xlu0 %68 }
  0xbb   :  { %v70_v29 = vadd.f32 %v69_v28, %v60_v27 }
  0xbd   :  { %72 = vst.msk [vmem:[#allocation2] sm:$0xff] %vm53_vm0, %v70_v29 }
  0xbe   :  { %v90_v31 = vpop.xlane.xlu0 %89 }
  0xbf   :  { %v91_v32 = vadd.f32 %v90_v31, %v81_v30 }
  0xc1   :  { %92 = vst.msk [vmem:[#allocation3] sm:$0xff] %vm53_vm0, %v91_v32 }
  0xc4   :  { %v96_v33 = vld [vmem:[#allocation2] sm:$0xff] }
  0xc5   :  { %97 = vst.msk [vmem:[%s222_s2] sm:$0xff] %vm53_vm0, %v96_v33 }
  0xc8   :  { %v98_v34 = vld [vmem:[#allocation3] sm:$0xff] }
  0xc9   :  { %99 = vst.msk [vmem:[%s223_s3] sm:$0xff] %vm53_vm0, %v98_v34 }
  0xca   :  { %108 = vsyncpa [#allocation5], 1 }
  0xcb   :  { %109 = vsyncpa [#allocation7], 1 }

</bundles_post_ra>
